<compile_context>
chip_gen: v6e
topology: v6e:2x2x1
jax: 0.10.0
libtpu: 0.0.40
codegen_flags: <defaults>
</compile_context>

<pallas_src>
import functools

import numpy as np

import jax
import jax.numpy as jnp
from jax.experimental import pallas as pl
from jax.experimental.pallas import tpu as pltpu


def get_out_dim(in_dim: int, max_freq: int) -> int:
    """Mirror of PositionalEncoding.get_out_dim."""
    return in_dim + in_dim * max_freq * 2


def _pe_kernel(x_ref, o_ref, *, in_dim, freqs):
    """One lane-dense block: rows on lanes, features/encodings on sublanes.

    x_ref: (in_dim, L)
    o_ref: (in_dim + 2*in_dim*F, L) laid out as
        rows [0:in_dim]                    = x                (pass-through)
        rows [in_dim + m*F + f]            = sin(x[m] * 2**f)
        rows [in_dim + MF + m*F + f]       = cos(x[m] * 2**f)
    which matches torch's cat([x, sin(encs), cos(encs)], -1) with
    encs = (x[..., None] * freq_bands).flatten(-2, -1).
    """
    num_freq = len(freqs)
    mf = in_dim * num_freq

    x = x_ref[...].astype(jnp.float32)                     # (M, L) lane-dense

    # Fused identity pass-through (was a wrapper-side concat = extra HBM pass).
    o_ref[0:in_dim, :] = x.astype(o_ref.dtype)

    base = in_dim
    for m in range(in_dim):
        xm = x[m:m + 1, :]                                 # (1, L)
        # freqs are compile-time Python floats -> scalar literals (no captured
        # array constants); each multiply is a full-lane VPU op.
        e = jnp.concatenate([xm * f for f in freqs], axis=0)   # (F, L)
        o_ref[base + m * num_freq:base + (m + 1) * num_freq, :] = (
            jnp.sin(e).astype(o_ref.dtype))
        o_ref[base + mf + m * num_freq:base + mf + (m + 1) * num_freq, :] = (
            jnp.cos(e).astype(o_ref.dtype))


def positional_encoding(x, max_freq, *, lane_tile=None, out_dtype=None,
                        lane_major_out=False):
    """Appended positional encoding via a Pallas TPU kernel.

    Args:
        x: float array of shape [..., M]
        max_freq: number of frequency bands (freq_bands = 2**[0..max_freq-1])
        lane_tile: optional lane-dim tile override (rounded to multiple of 128);
            by default it is chosen adaptively (~3 MiB output block, grid >= 2).
        out_dtype: output dtype; default follows torch promotion (float32).
            NOTE: bf16 also casts the x pass-through rows (deviation from torch).
        lane_major_out: if True, return the (out_dim, n) lane-major slab and
            skip the final transpose (for consumers that can fuse it).
    Returns:
        Array of shape [..., M + M*max_freq*2] = [x, sin(encs), cos(encs)]
        (or (out_dim, n) if lane_major_out).
    """
    in_dim = x.shape[-1]
    lead = x.shape[:-1]
    n = 1
    for d in lead:
        n *= d

    if out_dtype is None:
        # torch: x * f32 buffer then cat -> promotes to float32 for f32/bf16 x.
        out_dtype = jnp.result_type(x.dtype, jnp.float32)
    out_dtype = jnp.dtype(out_dtype)

    # freq_bands = 2 ** linspace(0, max_freq-1, max_freq): baked as Python
    # float scalars (NOT an array constant -> no "captures constants" error).
    freqs = tuple(
        float(v) for v in 2.0 ** np.linspace(0.0, max_freq - 1, num=max_freq,
                                             dtype=np.float64))
    enc_dim = 2 * in_dim * max_freq
    out_dim = in_dim + enc_dim

    x2 = x.reshape(n, in_dim)
    xT = x2.T                      # (in_dim, n): rows -> lanes (layout plumbing)

    # ---- adaptive lane tile ------------------------------------------------
    bytes_per_lane = out_dim * out_dtype.itemsize + in_dim * x.dtype.itemsize
    if n <= 128:
        lane = n                                   # single full-extent block
    else:
        if lane_tile is None:
            # ~3 MiB of HBM traffic per block: >85-90% of roofline while the
            # double-buffered VMEM footprint stays ~8 MiB << 32 MiB scoped.
            target = ((3 << 20) // bytes_per_lane // 128) * 128
        else:
            target = (int(lane_tile) // 128) * 128
        target = max(128, int(target))
        n_padded = pl.cdiv(n, 128) * 128
        lane = min(target, n_padded)
        # Keep >= 2 grid steps so "parallel" shards across both v7x TCs.
        half_padded = pl.cdiv(pl.cdiv(n, 2), 128) * 128
        lane = max(128, min(lane, half_padded))

    grid = (pl.cdiv(n, lane),)

    kernel = functools.partial(_pe_kernel, in_dim=in_dim, freqs=freqs)

    cost = pl.CostEstimate(
        flops=n * in_dim * max_freq,
        transcendentals=2 * n * in_dim * max_freq,
        bytes_accessed=n * in_dim * x.dtype.itemsize
        + n * out_dim * out_dtype.itemsize,
    )

    out_t = pl.pallas_call(
        kernel,
        out_shape=jax.ShapeDtypeStruct((out_dim, n), out_dtype),
        grid=grid,
        in_specs=[pl.BlockSpec((in_dim, lane), lambda i: (0, i))],
        out_specs=pl.BlockSpec((out_dim, lane), lambda i: (0, i)),
        compiler_params=pltpu.CompilerParams(
            dimension_semantics=("parallel",)),
        cost_estimate=cost,
    )(xT)

    if lane_major_out:
        # TODO(synk): downstream consumers that can take the lane-major slab
        # (or fuse the transpose into an MXU operand) avoid the epilogue pass.
        return out_t

    # Final layout plumbing back to torch order.
    return out_t.T.reshape(*lead, out_dim)


def positional_encoding_ref(x, max_freq):
    """Pure-JAX reference mirroring the torch forward()."""
    fb = 2.0 ** jnp.linspace(0.0, max_freq - 1, max_freq, dtype=jnp.float32)
    encs = (x[..., None] * fb).reshape(*x.shape[:-1], -1)
    return jnp.concatenate([x, jnp.sin(encs), jnp.cos(encs)], axis=-1)


if __name__ == "__main__":
    max_freq = 4

    # Small shape consistent with the module: [..., M] with M = 3.
    x = jax.random.normal(jax.random.PRNGKey(0), (2, 8, 3), dtype=jnp.float32)
    out = jax.block_until_ready(positional_encoding(x, max_freq))
    ref = positional_encoding_ref(x, max_freq)
    assert out.shape == (2, 8, get_out_dim(3, max_freq)), out.shape
    assert out.dtype == ref.dtype
    assert jnp.allclose(out, ref, atol=1e-5, rtol=1e-5), "mismatch vs reference"

    # Larger case exercising a multi-step grid and the ragged last lane block.
    x2 = jax.random.normal(jax.random.PRNGKey(1), (4, 100, 3), dtype=jnp.float32)
    out2 = jax.block_until_ready(positional_encoding(x2, max_freq))
    ref2 = positional_encoding_ref(x2, max_freq)
    assert out2.shape == (4, 100, get_out_dim(3, max_freq)), out2.shape
    assert jnp.allclose(out2, ref2, atol=1e-5, rtol=1e-5), "mismatch (tiled)"

    # Explicit small lane_tile to force several grid steps.
    out2b = jax.block_until_ready(
        positional_encoding(x2, max_freq, lane_tile=128))
    assert jnp.allclose(out2b, ref2, atol=1e-5, rtol=1e-5), "mismatch (128-lane)"

    # bf16 output path (compute in f32, cast on store) — v5e bandwidth lever.
    # Note: this also casts the x pass-through rows (documented deviation).
    out3 = jax.block_until_ready(
        positional_encoding(x2, max_freq, out_dtype=jnp.bfloat16))
    assert out3.dtype == jnp.bfloat16
    assert jnp.allclose(out3.astype(jnp.float32), ref2, atol=3e-2, rtol=3e-2), \
        "mismatch (bf16 output)"

    print("KERNEL_OK")
</pallas_src>

<mosaic_0001>
module attributes {stable_mosaic.version = 11 : i64} {
  func.func @_pe_kernel(%arg0: i32, %arg1: memref<3x16xf32, #tpu.memory_space<vmem>>, %arg2: memref<27x16xf32, #tpu.memory_space<vmem>>) attributes {dimension_semantics = [#tpu.dimension_semantics<parallel>], iteration_bounds = array<i64: 1>, scalar_prefetch = 0 : i64, scratch_operands = 0 : i64, tpu.core_type = #tpu.core_type<tc>, window_params = [{transform_indices = @transform_0, window_bounds = array<i64: 3, 16>}, {transform_indices = @transform_1, window_bounds = array<i64: 27, 16>}]} {
    %c0 = arith.constant 0 : index
    %c0_0 = arith.constant 0 : index
    %0 = vector.load %arg1[%c0, %c0_0] : memref<3x16xf32, #tpu.memory_space<vmem>>, vector<3x16xf32>
    %c0_1 = arith.constant 0 : index
    %c0_2 = arith.constant 0 : index
    %1 = vector.load %arg2[%c0_1, %c0_2] : memref<27x16xf32, #tpu.memory_space<vmem>>, vector<3x16xf32>
    tpu.vector_store %arg2[%c0_1, %c0_2], %0 {strides = array<i32>} : memref<27x16xf32, #tpu.memory_space<vmem>>, vector<3x16xf32>,
    %2 = vector.extract_strided_slice %0 {offsets = [0, 0], sizes = [1, 16], strides = [1, 1]} : vector<3x16xf32> to vector<1x16xf32>
    %cst = arith.constant 1.000000e+00 : f32
    %3 = vector.broadcast %cst : f32 to vector<1x16xf32>
    %4 = arith.mulf %2, %3 : vector<1x16xf32>
    %cst_3 = arith.constant 2.000000e+00 : f32
    %5 = vector.broadcast %cst_3 : f32 to vector<1x16xf32>
    %6 = arith.mulf %2, %5 : vector<1x16xf32>
    %cst_4 = arith.constant 4.000000e+00 : f32
    %7 = vector.broadcast %cst_4 : f32 to vector<1x16xf32>
    %8 = arith.mulf %2, %7 : vector<1x16xf32>
    %cst_5 = arith.constant 8.000000e+00 : f32
    %9 = vector.broadcast %cst_5 : f32 to vector<1x16xf32>
    %10 = arith.mulf %2, %9 : vector<1x16xf32>
    %11 = tpu.concatenate %4, %6, %8, %10 in 0 : vector<1x16xf32>, vector<1x16xf32>, vector<1x16xf32>, vector<1x16xf32> -> vector<4x16xf32>
    %12 = math.sin %11 : vector<4x16xf32>
    %c3 = arith.constant 3 : index
    %c0_6 = arith.constant 0 : index
    %13 = vector.load %arg2[%c3, %c0_6] : memref<27x16xf32, #tpu.memory_space<vmem>>, vector<4x16xf32>
    tpu.vector_store %arg2[%c3, %c0_6], %12 {strides = array<i32>} : memref<27x16xf32, #tpu.memory_space<vmem>>, vector<4x16xf32>,
    %14 = math.cos %11 : vector<4x16xf32>
    %c15 = arith.constant 15 : index
    %c0_7 = arith.constant 0 : index
    %15 = vector.load %arg2[%c15, %c0_7] : memref<27x16xf32, #tpu.memory_space<vmem>>, vector<4x16xf32>
    tpu.vector_store %arg2[%c15, %c0_7], %14 {strides = array<i32>} : memref<27x16xf32, #tpu.memory_space<vmem>>, vector<4x16xf32>,
    %16 = vector.extract_strided_slice %0 {offsets = [1, 0], sizes = [1, 16], strides = [1, 1]} : vector<3x16xf32> to vector<1x16xf32>
    %cst_8 = arith.constant 1.000000e+00 : f32
    %17 = vector.broadcast %cst_8 : f32 to vector<1x16xf32>
    %18 = arith.mulf %16, %17 : vector<1x16xf32>
    %cst_9 = arith.constant 2.000000e+00 : f32
    %19 = vector.broadcast %cst_9 : f32 to vector<1x16xf32>
    %20 = arith.mulf %16, %19 : vector<1x16xf32>
    %cst_10 = arith.constant 4.000000e+00 : f32
    %21 = vector.broadcast %cst_10 : f32 to vector<1x16xf32>
    %22 = arith.mulf %16, %21 : vector<1x16xf32>
    %cst_11 = arith.constant 8.000000e+00 : f32
    %23 = vector.broadcast %cst_11 : f32 to vector<1x16xf32>
    %24 = arith.mulf %16, %23 : vector<1x16xf32>
    %25 = tpu.concatenate %18, %20, %22, %24 in 0 : vector<1x16xf32>, vector<1x16xf32>, vector<1x16xf32>, vector<1x16xf32> -> vector<4x16xf32>
    %26 = math.sin %25 : vector<4x16xf32>
    %c7 = arith.constant 7 : index
    %c0_12 = arith.constant 0 : index
    %27 = vector.load %arg2[%c7, %c0_12] : memref<27x16xf32, #tpu.memory_space<vmem>>, vector<4x16xf32>
    tpu.vector_store %arg2[%c7, %c0_12], %26 {strides = array<i32>} : memref<27x16xf32, #tpu.memory_space<vmem>>, vector<4x16xf32>,
    %28 = math.cos %25 : vector<4x16xf32>
    %c19 = arith.constant 19 : index
    %c0_13 = arith.constant 0 : index
    %29 = vector.load %arg2[%c19, %c0_13] : memref<27x16xf32, #tpu.memory_space<vmem>>, vector<4x16xf32>
    tpu.vector_store %arg2[%c19, %c0_13], %28 {strides = array<i32>} : memref<27x16xf32, #tpu.memory_space<vmem>>, vector<4x16xf32>,
    %30 = vector.extract_strided_slice %0 {offsets = [2, 0], sizes = [1, 16], strides = [1, 1]} : vector<3x16xf32> to vector<1x16xf32>
    %cst_14 = arith.constant 1.000000e+00 : f32
    %31 = vector.broadcast %cst_14 : f32 to vector<1x16xf32>
    %32 = arith.mulf %30, %31 : vector<1x16xf32>
    %cst_15 = arith.constant 2.000000e+00 : f32
    %33 = vector.broadcast %cst_15 : f32 to vector<1x16xf32>
    %34 = arith.mulf %30, %33 : vector<1x16xf32>
    %cst_16 = arith.constant 4.000000e+00 : f32
    %35 = vector.broadcast %cst_16 : f32 to vector<1x16xf32>
    %36 = arith.mulf %30, %35 : vector<1x16xf32>
    %cst_17 = arith.constant 8.000000e+00 : f32
    %37 = vector.broadcast %cst_17 : f32 to vector<1x16xf32>
    %38 = arith.mulf %30, %37 : vector<1x16xf32>
    %39 = tpu.concatenate %32, %34, %36, %38 in 0 : vector<1x16xf32>, vector<1x16xf32>, vector<1x16xf32>, vector<1x16xf32> -> vector<4x16xf32>
    %40 = math.sin %39 : vector<4x16xf32>
    %c11 = arith.constant 11 : index
    %c0_18 = arith.constant 0 : index
    %41 = vector.load %arg2[%c11, %c0_18] : memref<27x16xf32, #tpu.memory_space<vmem>>, vector<4x16xf32>
    tpu.vector_store %arg2[%c11, %c0_18], %40 {strides = array<i32>} : memref<27x16xf32, #tpu.memory_space<vmem>>, vector<4x16xf32>,
    %42 = math.cos %39 : vector<4x16xf32>
    %c23 = arith.constant 23 : index
    %c0_19 = arith.constant 0 : index
    %43 = vector.load %arg2[%c23, %c0_19] : memref<27x16xf32, #tpu.memory_space<vmem>>, vector<4x16xf32>
    tpu.vector_store %arg2[%c23, %c0_19], %42 {strides = array<i32>} : memref<27x16xf32, #tpu.memory_space<vmem>>, vector<4x16xf32>,
    return
  }
  func.func @transform_0(%arg0: i32) -> (i32, i32) {
    %c0_i32 = arith.constant 0 : i32
    %c0_i32_0 = arith.constant 0 : i32
    return %c0_i32, %arg0 : i32, i32
  }
  func.func @transform_1(%arg0: i32) -> (i32, i32) {
    %c0_i32 = arith.constant 0 : i32
    %c0_i32_0 = arith.constant 0 : i32
    return %c0_i32, %arg0 : i32, i32
  }
}

</mosaic_0001>

<bundles_post_ra>
// kernel: tpu_custom_call.1
= control target key start
LH: loop header
LB: loop body
LE: loop exit
PB: predicated region body
PF: predicated region fallthrough
CT: control target
= control target key end

     0   :  { %6 = vsyncpa [#allocation3], 0  ;;  %s770_s6 = smov [#allocation2]   ;;  %s1009_s0 = inlined_call_operand.hbm [shape: f32[3,16], index: 0, kind: input, shape index: {}]   ;;  %s1010_s1 = inlined_call_operand.vmem [shape: f32[27,16], index: 1, kind: output, shape index: {}]  }
   0x1   :  { %s13_s7 = sshll.u32 %s770_s6, 4  ;;  %s14_s7 = int_to_ptr.vmem [resolvable:$true] %s13_s7 }
   0x2   :  { %s756_s8 = scalar_lea.vmem %s14_s7, 64  ;;  %p761_p1 = scmp.lt.s32.totalorder %s14_s7, %s14_s7 }
   0x3   :  { %p757_p0 = scmp.ne.s32.totalorder %s14_s7, %s756_s8  ;;  %p762_p2 = scmp.lt.s32.totalorder %s756_s8, %s756_s8 }
   0x5   :  { %p763_p3 = por %p762_p2, %p761_p1 }
   0x7   :  { %p764_p4 = pnand %p763_p3, %p757_p0 }
   0x9   :  { %767 = shalt.err (!%p764_p4)
}
   0xa   :  { %16 = dma.hbm_to_vmem [thread:$0]  %s1009_s0, 64, %s14_s7, [#allocation3]  }
   0xb   :  { %768 = dma.done.wait [#allocation3], 64  }
   0xc   :  { %769 = vsyncadd [#allocation3], 4294967232  ;;  %vm21_vm0 = vcmask 124928   ;;  %v20_v0 = vld [vmem:[#allocation2] sm:$0x7]  ;;  %vm35_vm1 = vcmask 1040384  }
   0xd   :  { %22 = vst.msk [vmem:[%s1010_s1] sm:$0x7] %vm21_vm0, %v20_v0  ;;  %v23_v1 = vmul.f32 2.0, %v20_v0  ;;  %v24_v2 = vmul.f32 4.0, %v20_v0  ;;  %v25_v3 = vmul.f32 8.0, %v20_v0  ;;  %v252_v4 = vrot.slane %v20_v0, 1 }
   0xe   :  { %vm37_vm2 = vcmask 1041408   ;;  %vm39_vm3 = vcmask 1042432   ;;  %v470_v5 = vrot.slane %v20_v0, 2  ;;  %v771_v47 = vmov 683565275  }
   0xf   :  { %v27_v6 = vrot.slane %v23_v1, 7  ;;  %v30_v7 = vrot.slane %v24_v2, 6  ;;  %v33_v8 = vrot.slane %v25_v3, 5  ;;  %v254_v9 = vrot.slane %v24_v2, 7 }
  0x10   :  { %v256_v10 = vrot.slane %v25_v3, 6  ;;  %v258_v11 = vsel %vm35_vm1, %v252_v4, %v23_v1  ;;  %v472_v12 = vrot.slane %v23_v1, 1  ;;  %v474_v17 = vrot.slane %v25_v3, 7 }
  0x11   :  { %v36_v13 = vsel %vm35_vm1, %v20_v0, %v27_v6  ;;  %v259_v14 = vsel %vm37_vm2, %v258_v11, %v254_v9  ;;  %v772_v49 = vmov 2475754826   ;;  %v773_v55 = vmov 2131351028  }
  0x12   :  { %v38_v15 = vsel %vm37_vm2, %v36_v13, %v30_v7  ;;  %v798_v16 = vsel %vm39_vm3, %v259_v14, %v256_v10  ;;  %v476_v21 = vsel %vm35_vm1, %v470_v5, %v472_v12  ;;  %v774_v57 = vmov 2102212464  }
  0x13   :  { %v801_v18 = vsel %vm39_vm3, %v38_v15, %v33_v8  ;;  %v261_v19 = vand.u32 2147483647, %v798_v16  ;;  %v264_v20 = vand.u32 2139095040, %v798_v16  ;;  %v477_v28 = vsel %vm37_vm2, %v476_v21, %v24_v2 }
  0x14   :  { %v41_v22 = vand.u32 2147483647, %v801_v18  ;;  %v44_v23 = vand.u32 2139095040, %v801_v18  ;;  %v814_v30 = vsel %vm39_vm3, %v477_v28, %v474_v17  ;;  %v775_v59 = vmov 920167782  }
  0x15   :  { %v265_v24 = vshrl.u32 %v264_v20, 23  ;;  %v268_v25 = vand.u32 8388607, %v261_v19  ;;  %v482_v34 = vand.u32 2139095040, %v814_v30  ;;  %v776_v3 = vmov 1326507024  }
  0x16   :  { %v45_v26 = vshrl.u32 %v44_v23, 23  ;;  %v48_v27 = vand.u32 8388607, %v41_v22 }
  0x17   :  { %v701_v29 = vadd.s32 4294967169, %v265_v24  ;;  %v269_v32 = vor.u32 8388608, %v268_v25  ;;  %v483_v37 = vshrl.u32 %v482_v34, 23 }
  0x18   :  { %v693_v31 = vadd.s32 4294967169, %v45_v26  ;;  %v49_v35 = vor.u32 8388608, %v48_v27 }
  0x19   :  { %v271_v33 = vadd.s32 1, %v701_v29  ;;  %v817_v41 = vshll.u32 %v269_v32, 8  ;;  %v825_v51 = vadd.s32 4294967169, %v483_v37 }
  0x1a   :  { %v51_v36 = vadd.s32 1, %v693_v31  ;;  %v819_v44 = vshll.u32 %v49_v35, 8 }
  0x1b   :  { %vm272_vm4 = vcmp.gt.s32.totalorder %v271_v33, 0 }
  0x1c   :  { %vm52_vm5 = vcmp.gt.s32.totalorder %v51_v36, 0  ;;  %v273_v38 = vsel %vm272_vm4, %v271_v33, 0 }
  0x1d   :  { %v53_v39 = vsel %vm52_vm5, %v51_v36, 0  ;;  %v275_v40 = vand.u32 31, %v273_v38  ;;  %v821_v45 = vshrl.u32 %v273_v38, 5 }
  0x1e   :  { %v54_v42 = vshrl.u32 %v53_v39, 5  ;;  %v55_v43 = vand.u32 31, %v53_v39 }
  0x1f   :  { %v276_v46 = vsub.s32 32, %v275_v40  ;;  %v278_v48 = vshll.u32 %v771_v47, %v275_v40  ;;  %v281_v50 = vshll.u32 %v772_v49, %v275_v40  ;;  %v284_v61 = vshll.u32 %v773_v55, %v275_v40 }
  0x20   :  { %v56_v52 = vsub.s32 32, %v55_v43  ;;  %v58_v53 = vshll.u32 %v771_v47, %v55_v43  ;;  %v61_v54 = vshll.u32 %v772_v49, %v55_v43  ;;  %v64_v56 = vshll.u32 %v773_v55, %v55_v43 }
  0x21   :  { %v67_v58 = vshll.u32 %v774_v57, %v55_v43  ;;  %v70_v60 = vshll.u32 %v775_v59, %v55_v43  ;;  %vm73_vm6 = vcmp.lt.s32.totalorder %v54_v42, 1  ;;  %vm74_vm7 = vcmp.lt.s32.totalorder %v54_v42, 2 }
  0x22   :  { %v57_v62 = vshrl.u32 %v771_v47, %v56_v52  ;;  %v59_v63 = vshrl.u32 %v772_v49, %v56_v52  ;;  %v62_v0 = vshrl.u32 %v773_v55, %v56_v52  ;;  %v65_v1 = vshrl.u32 %v774_v57, %v56_v52 }
  0x23   :  { %v68_v2 = vshrl.u32 %v775_v59, %v56_v52  ;;  %v71_v4 = vshrl.u32 %v776_v3, %v56_v52  ;;  %vm75_vm8 = vcmp.lt.s32.totalorder %v54_v42, 3  ;;  %vm76_vm9 = vcmp.lt.s32.totalorder %v54_v42, 4 }
  0x24   :  { %v60_v5 = vor.u32 %v59_v63, %v58_v53  ;;  %v63_v6 = vor.u32 %v62_v0, %v61_v54  ;;  %v66_v7 = vor.u32 %v65_v1, %v64_v56  ;;  %v279_v10 = vshrl.u32 %v772_v49, %v276_v46 }
  0x25   :  { %v69_v8 = vor.u32 %v68_v2, %v67_v58  ;;  %v72_v9 = vor.u32 %v71_v4, %v70_v60  ;;  %v282_v11 = vshrl.u32 %v773_v55, %v276_v46  ;;  %v277_v23 = vshrl.u32 %v771_v47, %v276_v46 }
  0x26   :  { %v77_v12 = vsel %vm73_vm6, %v57_v62, %v60_v5  ;;  %v78_v13 = vsel %vm76_vm9, %v66_v7, 2102212464  ;;  %v81_v14 = vsel %vm73_vm6, %v60_v5, %v63_v6  ;;  %v85_v15 = vsel %vm73_vm6, %v63_v6, %v66_v7 }
  0x27   :  { %v79_v17 = vsel %vm75_vm8, %v63_v6, %v78_v13  ;;  %v82_v20 = vsel %vm76_vm9, %v69_v8, 920167782  ;;  %v86_v21 = vsel %vm76_vm9, %v72_v9, 1326507024  ;;  %v280_v27 = vor.u32 %v279_v10, %v278_v48 }
  0x28   :  { %v80_v24 = vsel %vm74_vm7, %v77_v12, %v79_v17  ;;  %v83_v25 = vsel %vm75_vm8, %v66_v7, %v82_v20  ;;  %v87_v26 = vsel %vm75_vm8, %v69_v8, %v86_v21  ;;  %v283_v31 = vor.u32 %v282_v11, %v281_v50 }
  0x29   :  { %v84_v28 = vsel %vm74_vm7, %v81_v14, %v83_v25  ;;  %v88_v29 = vsel %vm74_vm7, %v85_v15, %v87_v26  ;;  %v285_v32 = vshrl.u32 %v774_v57, %v276_v46  ;;  %v287_v38 = vshll.u32 %v774_v57, %v275_v40 }
  0x2a   :  { %v853_v33 = vmul.u32.u64.low %v819_v44, %v88_v29  ;;  %v854_v34 = vmul.u32.u64.high %v819_v44, %v88_v29, %v853_v33  ;;  %v857_v35 = vmul.u32.u64.low %v819_v44, %v84_v28  ;;  %v858_v36 = vmul.u32.u64.high %v819_v44, %v84_v28, %v857_v35 }
  0x2b   :  { %v286_v37 = vor.u32 %v285_v32, %v284_v61  ;;  %v288_v39 = vshrl.u32 %v775_v59, %v276_v46  ;;  %v290_v42 = vshll.u32 %v775_v59, %v275_v40  ;;  %v96_v43 = vmul.u32 %v819_v44, %v80_v24 }
  0x2c   :  { %v291_v48 = vshrl.u32 %v776_v3, %v276_v46  ;;  %vm293_vm10 = vcmp.lt.s32.totalorder %v821_v45, 1  ;;  %vm294_vm11 = vcmp.lt.s32.totalorder %v821_v45, 2  ;;  %vm295_vm12 = vcmp.lt.s32.totalorder %v821_v45, 3 }
  0x2d   :  { %v289_v50 = vor.u32 %v288_v39, %v287_v38  ;;  %vm296_vm13 = vcmp.lt.s32.totalorder %v821_v45, 4  ;;  %v297_v52 = vsel %vm293_vm10, %v277_v23, %v280_v27  ;;  %vm98_vm14 = vc.u32 %v854_v34, %v857_v35 }
  0x2e   :  { %v99_v53 = vadd.s32 1, %v858_v36  ;;  %v292_v40 = vor.u32 %v291_v48, %v290_v42  ;;  %v301_v54 = vsel %vm293_vm10, %v280_v27, %v283_v31  ;;  %v298_v44 = vsel %vm296_vm13, %v286_v37, 2102212464 }
  0x2f   :  { %v302_v56 = vsel %vm296_vm13, %v289_v50, 920167782  ;;  %v305_v46 = vsel %vm293_vm10, %v283_v31, %v286_v37  ;;  %v489_v58 = vadd.s32 1, %v825_v51  ;;  %v299_v61 = vsel %vm295_vm12, %v283_v31, %v298_v44 }
  0x30   :  { %v100_v60 = vsel %vm98_vm14, %v99_v53, %v858_v36  ;;  %v303_v62 = vsel %vm295_vm12, %v286_v37, %v302_v56  ;;  %v306_v63 = vsel %vm296_vm13, %v292_v40, 1326507024  ;;  %v300_v4 = vsel %vm294_vm11, %v297_v52, %v299_v61 }
  0x31   :  { %v101_v0 = vadd.s32 %v100_v60, %v96_v43  ;;  %v304_v1 = vsel %vm294_vm11, %v301_v54, %v303_v62  ;;  %v307_v2 = vsel %vm295_vm12, %v289_v50, %v306_v63  ;;  %vm490_vm15 = vcmp.gt.s32.totalorder %v489_v58, 0 }
  0x32   :  { %v308_v51 = vsel %vm294_vm11, %v305_v46, %v307_v2  ;;  %v888_v5 = vmul.u32.u64.low %v817_v41, %v304_v1  ;;  %v889_v6 = vmul.u32.u64.high %v817_v41, %v304_v1, %v888_v5  ;;  %v316_v11 = vmul.u32 %v817_v41, %v300_v4 }
  0x33   :  { %v102_v7 = vadd.s32 536870912, %v101_v0  ;;  %v892_v8 = vmul.u32.u64.low %v817_v41, %v308_v51  ;;  %v893_v9 = vmul.u32.u64.high %v817_v41, %v308_v51, %v892_v8  ;;  %v491_v12 = vsel %vm490_vm15, %v489_v58, 0 }
  0x34   :  { %v319_v13 = vadd.s32 1, %v889_v6  ;;  %v479_v14 = vand.u32 2147483647, %v814_v30  ;;  %v493_v17 = vand.u32 31, %v491_v12  ;;  %v907_v31 = vshrl.u32 %v491_v12, 5 }
  0x35   :  { %v895_v10 = vshrl.u32 %v102_v7, 30  ;;  %vm318_vm0 = vc.u32 %v893_v9, %v888_v5  ;;  %v97_v54 = vadd.s32 %v857_v35, %v854_v34  ;;  %v317_v35 = vadd.s32 %v888_v5, %v893_v9 }
  0x36   :  { %v320_v15 = vsel %vm318_vm0, %v319_v13, %v889_v6  ;;  %v486_v25 = vand.u32 8388607, %v479_v14  ;;  %v494_v41 = vsub.s32 32, %v493_v17  ;;  %v496_v32 = vshll.u32 %v771_v47, %v493_v17 }
  0x37   :  { %v104_v45 = vshll.u32 %v895_v10, 30  ;;  %v321_v21 = vadd.s32 %v320_v15, %v316_v11  ;;  %v499_v37 = vshll.u32 %v772_v49, %v493_v17  ;;  %v502_v42 = vshll.u32 %v773_v55, %v493_v17 }
  0x38   :  { %v487_v29 = vor.u32 8388608, %v486_v25  ;;  %v497_v36 = vshrl.u32 %v772_v49, %v494_v41  ;;  %v500_v38 = vshrl.u32 %v773_v55, %v494_v41  ;;  %v503_v43 = vshrl.u32 %v774_v57, %v494_v41 }
  0x39   :  { %v105_v20 = vsub.s32 %v101_v0, %v104_v45  ;;  %v322_v24 = vadd.s32 536870912, %v321_v21  ;;  %v505_v48 = vshll.u32 %v774_v57, %v493_v17  ;;  %v506_v52 = vshrl.u32 %v775_v59, %v494_v41 }
  0x3a   :  { %v508_v53 = vshll.u32 %v775_v59, %v493_v17  ;;  %v509_v40 = vshrl.u32 %v776_v3, %v494_v41  ;;  %v495_v49 = vshrl.u32 %v771_v47, %v494_v41  ;;  %v923_v44 = vshll.u32 %v487_v29, 8 }
  0x3b   :  { %v107_v23 = vsub.s32 0, %v105_v20  ;;  %v905_v27 = vshrl.u32 %v322_v24, 30  ;;  %v498_v46 = vor.u32 %v497_v36, %v496_v32  ;;  %v501_v58 = vor.u32 %v500_v38, %v499_v37 }
  0x3c   :  { %v504_v62 = vor.u32 %v503_v43, %v502_v42  ;;  %v507_v59 = vor.u32 %v506_v52, %v505_v48  ;;  %v510_v0 = vor.u32 %v509_v40, %v508_v53  ;;  %vm511_vm2 = vcmp.lt.s32.totalorder %v907_v31, 1 }
  0x3d   :  { %v694_v26 = vmin.u32 %v107_v23, %v105_v20  ;;  %v324_v33 = vshll.u32 %v905_v27, 30  ;;  %vm514_vm3 = vcmp.lt.s32.totalorder %v907_v31, 4  ;;  %vm512_vm4 = vcmp.lt.s32.totalorder %v907_v31, 2 }
  0x3e   :  { %vm513_vm5 = vcmp.lt.s32.totalorder %v907_v31, 3  ;;  %v515_v1 = vsel %vm511_vm2, %v495_v49, %v498_v46  ;;  %v516_v51 = vsel %vm514_vm3, %v504_v62, 2102212464  ;;  %v519_v6 = vsel %vm511_vm2, %v498_v46, %v501_v58 }
  0x3f   :  { %v109_v28 = vclz %v694_v26  ;;  %v325_v50 = vsub.s32 %v321_v21, %v324_v33  ;;  %v520_v8 = vsel %vm514_vm3, %v507_v59, 920167782  ;;  %v523_v11 = vsel %vm511_vm2, %v501_v58, %v504_v62 }
  0x40   :  { %v524_v12 = vsel %vm514_vm3, %v510_v0, 1326507024  ;;  %v521_v15 = vsel %vm513_vm5, %v504_v62, %v520_v8  ;;  %v517_v9 = vsel %vm513_vm5, %v501_v58, %v516_v51  ;;  %vm43_vm7 = vcmp.lt.s32.totalorder %v801_v18, 0 }
  0x41   :  { %v695_v39 = vadd.s32 4294967294, %v109_v28  ;;  %v327_v56 = vsub.s32 0, %v325_v50  ;;  %v525_v5 = vsel %vm513_vm5, %v507_v59, %v524_v12  ;;  %v522_v17 = vsel %vm512_vm4, %v519_v6, %v521_v15 }
  0x42   :  { %v518_v32 = vsel %vm512_vm4, %v515_v1, %v517_v9  ;;  %v941_v33 = vmul.u32.u64.low %v923_v44, %v522_v17  ;;  %v942_v36 = vmul.u32.u64.high %v923_v44, %v522_v17, %v941_v33  ;;  %v127_v37 = vsub.s32 4, %v895_v10 }
  0x43   :  { %vm696_vm1 = vcmp.lt.s32.totalorder %v695_v39, 0  ;;  %v702_v63 = vmin.u32 %v327_v56, %v325_v50  ;;  %vm949_vm8 = vcmp.le.f32.partialorder %v41_v22, 0.7853982  ;;  %vm263_vm10 = vcmp.lt.s32.totalorder %v798_v16, 0 }
  0x44   :  { %v112_v55 = vsel %vm696_vm1, 0, %v695_v39  ;;  %v537_v53 = vadd.s32 1, %v942_v36  ;;  %v128_v40 = vsel %vm43_vm7, %v127_v37, %v895_v10  ;;  %v347_v10 = vsub.s32 4, %v905_v27 }
  0x45   :  { %v113_v57 = vsub.s32 32, %v112_v55  ;;  %v114_v60 = vshll.u32 %v105_v20, %v112_v55  ;;  %v117_v61 = vsub.s32 4294967266, %v112_v55  ;;  %v329_v47 = vclz %v702_v63 }
  0x46   :  { %v526_v20 = vsel %vm512_vm4, %v523_v11, %v525_v5  ;;  %v130_v46 = vsel %vm949_vm8, 0, %v128_v40  ;;  %vm262_vm11 = vcmp.le.f32.partialorder %v261_v19, 0.7853982  ;;  %v348_v0 = vsel %vm263_vm10, %v347_v10, %v905_v27 }
  0x47   :  { %v115_v3 = vshrl.u32 %v97_v54, %v113_v57  ;;  %v118_v34 = vadd.s32 127, %v117_v61  ;;  %v703_v7 = vadd.s32 4294967294, %v329_v47  ;;  %v350_v1 = vsel %vm262_vm11, 0, %v348_v0 }
  0x48   :  { %v935_v24 = vmul.u32.u64.low %v923_v44, %v526_v20  ;;  %v936_v25 = vmul.u32.u64.high %v923_v44, %v526_v20, %v935_v24  ;;  %vm133_vm2 = vweird.f32 %v801_v18  ;;  %vm145_vm3 = vcmask 125952  }
  0x49   :  { %v116_v2 = vor.u32 %v115_v3, %v114_v60  ;;  %v119_v4 = vshll.u32 %v118_v34, 23  ;;  %vm704_vm6 = vcmp.lt.s32.totalorder %v703_v7, 0  ;;  %v134_v60 = vadd.s32 3, %v130_v46 }
  0x4a   :  { %v332_v23 = vsel %vm704_vm6, 0, %v703_v7  ;;  %vm536_vm9 = vc.u32 %v936_v25, %v941_v33  ;;  %v354_v7 = vadd.s32 3, %v350_v1  ;;  %v459_v20 = vand.u32 3, %v350_v1 }
  0x4b   :  { %v120_v13 = vor.u32 4788187, %v119_v4  ;;  %v123_v45 = vcvt.s32.f32 %v116_v2  ;;  %v333_v41 = vsub.s32 32, %v332_v23  ;;  %v334_v26 = vshll.u32 %v325_v50, %v332_v23 }
  0x4c   :  { %v337_v28 = vsub.s32 4294967266, %v332_v23  ;;  %v534_v50 = vmul.u32 %v923_v44, %v518_v32  ;;  %v538_v55 = vsel %vm536_vm9, %v537_v53, %v942_v36  ;;  %v135_v34 = vand.u32 3, %v134_v60 }
  0x4d   :  { %v121_v21 = vand.u32 2147483647, %v120_v13  ;;  %v335_v38 = vshrl.u32 %v317_v35, %v333_v41  ;;  %v240_v35 = vand.u32 3, %v130_v46  ;;  %v355_v17 = vand.u32 3, %v354_v7 }
  0x4e   :  { %v338_v39 = vadd.s32 127, %v337_v28  ;;  %v539_v44 = vadd.s32 %v538_v55, %v534_v50  ;;  %vm140_vm12 = vcmp.eq.s32.totalorder %v135_v34, 2  ;;  %vm137_vm14 = vcmp.eq.s32.totalorder %v135_v34, 0 }
  0x4f   :  { %v124_v29 = vmul.f32 %v123_v45, %v121_v21  ;;  %v336_v31 = vor.u32 %v335_v38, %v334_v26  ;;  %vm245_vm13 = vcmp.eq.s32.totalorder %v240_v35, 2  ;;  %vm242_vm15 = vcmp.eq.s32.totalorder %v240_v35, 0 }
  0x50   :  { %v339_v48 = vshll.u32 %v338_v39, 23  ;;  %v540_v57 = vadd.s32 536870912, %v539_v44  ;;  %vm136_vm0 = vcmp.lt.s32.totalorder %v135_v34, 2  ;;  %vm241_vm1 = vcmp.lt.s32.totalorder %v240_v35, 2 }
  0x51   :  { %v125_v43 = vxor.u32 2147483648, %v124_v29  ;;  %v343_v49 = vcvt.s32.f32 %v336_v31  ;;  %v535_v24 = vadd.s32 %v941_v33, %v936_v25  ;;  %vm360_vm5 = vcmp.eq.s32.totalorder %v355_v17, 2 }
  0x52   :  { %v340_v54 = vor.u32 4788187, %v339_v48  ;;  %v968_v62 = vshrl.u32 %v540_v57, 30  ;;  %vm461_vm6 = vcmp.eq.s32.totalorder %v459_v20, 0  ;;  %vm353_vm9 = vweird.f32 %v798_v16 }
  0x53   :  { %v126_v52 = vsel %vm43_vm7, %v125_v43, %v124_v29  ;;  %vm464_vm7 = vcmp.eq.s32.totalorder %v459_v20, 2 }
  0x54   :  { %v129_v22 = vsel %vm949_vm8, %v801_v18, %v126_v52  ;;  %v341_v56 = vand.u32 2147483647, %v340_v54  ;;  %v542_v59 = vshll.u32 %v968_v62, 30  ;;  %vm357_vm8 = vcmp.eq.s32.totalorder %v355_v17, 0 }
  0x55   :  { %736 = vcosq.f32 %v129_v22  ;;  %v565_v55 = vsub.s32 4, %v968_v62 }
  0x56   :  { %738 = vsinq.f32 %v129_v22  ;;  %v344_v58 = vmul.f32 %v343_v49, %v341_v56  ;;  %v543_v47 = vsub.s32 %v539_v44, %v542_v59 }
  0x58   :  { %v345_v61 = vxor.u32 2147483648, %v344_v58  ;;  %v545_v2 = vsub.s32 0, %v543_v47 }
  0x5a   :  { %v346_v63 = vsel %vm263_vm10, %v345_v61, %v344_v58  ;;  %v710_v19 = vmin.u32 %v545_v2, %v543_v47  ;;  %vm356_vm10 = vcmp.lt.s32.totalorder %v355_v17, 2 }
  0x5b   :  { %v349_v3 = vsel %vm262_vm11, %v798_v16, %v346_v63  ;;  %vm460_vm11 = vcmp.lt.s32.totalorder %v459_v20, 2 }
  0x5c   :  { %740 = vcosq.f32 %v349_v3  ;;  %v547_v8 = vclz %v710_v19 }
  0x5d   :  { %742 = vsinq.f32 %v349_v3 }
  0x5e   :  { %v711_v15 = vadd.s32 4294967294, %v547_v8 }
  0x60   :  { %vm712_vm4 = vcmp.lt.s32.totalorder %v711_v15, 0 }
  0x61   :  { %v550_v18 = vsel %vm712_vm4, 0, %v711_v15 }
  0x62   :  { %v737_v4 = vpop.eup %736  ;;  %v551_v41 = vsub.s32 32, %v550_v18  ;;  %v552_v26 = vshll.u32 %v543_v47, %v550_v18  ;;  %v555_v28 = vsub.s32 4294967266, %v550_v18 }
  0x63   :  { %v739_v51 = vpop.eup %738  ;;  %v141_v6 = vxor.u32 2147483648, %v737_v4 }
  0x64   :  { %v138_v27 = vxor.u32 2147483648, %v739_v51  ;;  %v553_v33 = vshrl.u32 %v535_v24, %v551_v41  ;;  %v556_v36 = vadd.s32 127, %v555_v28 }
  0x65   :  { %v142_v11 = vsel %vm140_vm12, %v141_v6, %v739_v51  ;;  %v247_v12 = vsel %vm245_vm13, %v141_v6, %v739_v51  ;;  %vm481_vm12 = vcmp.lt.s32.totalorder %v814_v30, 0  ;;  %vm480_vm13 = vcmp.le.f32.partialorder %v479_v14, 0.7853982 }
  0x66   :  { %v139_v13 = vsel %vm137_vm14, %v737_v4, %v138_v27  ;;  %v244_v45 = vsel %vm242_vm15, %v737_v4, %v138_v27  ;;  %v554_v42 = vor.u32 %v553_v33, %v552_v26  ;;  %v557_v43 = vshll.u32 %v556_v36, 23 }
  0x67   :  { %v143_v5 = vsel %vm136_vm0, %v139_v13, %v142_v11  ;;  %v248_v9 = vsel %vm241_vm1, %v244_v45, %v247_v12  ;;  %v566_v46 = vsel %vm481_vm12, %v565_v55, %v968_v62 }
  0x68   :  { %v144_v21 = vsel %vm133_vm2, nan, %v143_v5  ;;  %v249_v23 = vsel %vm133_vm2, nan, %v248_v9  ;;  %v558_v53 = vor.u32 4788187, %v557_v43  ;;  %v561_v40 = vcvt.s32.f32 %v554_v42 }
  0x69   :  { %146 = vst.msk [vmem:[%s1010_s1 + $0x3] sm:$0xf] %vm145_vm3, %v144_v21  ;;  %250 = vst.msk [vmem:[%s1010_s1 + $0xf] sm:$0xf] %vm145_vm3, %v249_v23  ;;  %v741_v29 = vpop.eup %740  ;;  %v568_v57 = vsel %vm480_vm13, 0, %v566_v46 }
  0x6a   :  { %v743_v25 = vpop.eup %742  ;;  %v361_v32 = vxor.u32 2147483648, %v741_v29  ;;  %v559_v16 = vand.u32 2147483647, %v558_v53  ;;  %v572_v10 = vadd.s32 3, %v568_v57  ;;  %v677_v61 = vand.u32 3, %v568_v57 }
  0x6b   :  { %v358_v37 = vxor.u32 2147483648, %v743_v25 }
  0x6c   :  { %v362_v38 = vsel %vm360_vm5, %v361_v32, %v743_v25  ;;  %v466_v39 = vsel %vm464_vm7, %v361_v32, %v743_v25  ;;  %v562_v49 = vmul.f32 %v561_v40, %v559_v16  ;;  %v573_v60 = vand.u32 3, %v572_v10 }
  0x6d   :  { %v359_v31 = vsel %vm357_vm8, %v741_v29, %v358_v37  ;;  %v463_v48 = vsel %vm461_vm6, %v741_v29, %v358_v37  ;;  %vm682_vm15 = vcmp.eq.s32.totalorder %v677_v61, 2  ;;  %vm679_vm1 = vcmp.eq.s32.totalorder %v677_v61, 0 }
  0x6e   :  { %v363_v50 = vsel %vm356_vm10, %v359_v31, %v362_v38  ;;  %v467_v52 = vsel %vm460_vm11, %v463_v48, %v466_v39  ;;  %v563_v56 = vxor.u32 2147483648, %v562_v49  ;;  %vm578_vm14 = vcmp.eq.s32.totalorder %v573_v60, 2 }
  0x6f   :  { %v364_v22 = vsel %vm353_vm9, nan, %v363_v50  ;;  %v468_v54 = vsel %vm353_vm9, nan, %v467_v52  ;;  %vm575_vm0 = vcmp.eq.s32.totalorder %v573_v60, 0  ;;  %vm574_vm2 = vcmp.lt.s32.totalorder %v573_v60, 2 }
  0x70   :  { %365 = vst.msk [vmem:[%s1010_s1 + $0x7] sm:$0xf] %vm145_vm3, %v364_v22  ;;  %469 = vst.msk [vmem:[%s1010_s1 + $0x13] sm:$0xf] %vm145_vm3, %v468_v54  ;;  %v564_v44 = vsel %vm481_vm12, %v563_v56, %v562_v49  ;;  %vm678_vm4 = vcmp.lt.s32.totalorder %v677_v61, 2  ;;  %vm571_vm5 = vweird.f32 %v814_v30 }
  0x71   :  { %v567_v58 = vsel %vm480_vm13, %v814_v30, %v564_v44 }
  0x72   :  { %744 = vcosq.f32 %v567_v58 }
  0x73   :  { %746 = vsinq.f32 %v567_v58 }
  0x7f   :  { %v745_v63 = vpop.eup %744 }
  0x80   :  { %v747_v59 = vpop.eup %746  ;;  %v579_v0 = vxor.u32 2147483648, %v745_v63 }
  0x81   :  { %v576_v14 = vxor.u32 2147483648, %v747_v59 }
  0x82   :  { %v580_v62 = vsel %vm578_vm14, %v579_v0, %v747_v59  ;;  %v684_v3 = vsel %vm682_vm15, %v579_v0, %v747_v59 }
  0x83   :  { %v577_v34 = vsel %vm575_vm0, %v745_v63, %v576_v14  ;;  %v681_v35 = vsel %vm679_vm1, %v745_v63, %v576_v14 }
  0x84   :  { %v581_v47 = vsel %vm574_vm2, %v577_v34, %v580_v62  ;;  %v685_v1 = vsel %vm678_vm4, %v681_v35, %v684_v3 }
  0x85   :  { %v582_v2 = vsel %vm571_vm5, nan, %v581_v47  ;;  %v686_v4 = vsel %vm571_vm5, nan, %v685_v1 }
  0x86   :  { %583 = vst.msk [vmem:[%s1010_s1 + $0xb] sm:$0xf] %vm145_vm3, %v582_v2  ;;  %687 = vst.msk [vmem:[%s1010_s1 + $0x17] sm:$0xf] %vm145_vm3, %v686_v4 }
  0x87   :  { %692 = vsyncpa [#allocation3], 1 }

</bundles_post_ra>
